<compile_context>
chip_gen: v7x
topology: tpu7x:2x2x1
jax: 0.10.0
libtpu: 0.0.40
codegen_flags: <defaults>
</compile_context>

<pallas_src>
import functools

import jax
import jax.numpy as jnp
from jax.experimental import pallas as pl
from jax.experimental.pallas import tpu as pltpu

LANE = 128          # TPU lane width; hidden layers are padded to this.
BIAS_ROWS = 8       # sublane-aligned bias block at the end of the slab
OUT_COLS = 8        # narrow output block (only column 0 is meaningful)
MAX_TILE_B = 2048   # batch-tile cap (VMEM stays at a few MiB)


def _round8(n):
    return ((n + 7) // 8) * 8


def _leaky_relu(x, slope=0.2):
    # max(x, slope*x) == LeakyReLU(slope) for slope in (0, 1)
    return jnp.maximum(x, slope * x)


def discriminator_kernel(state_ref, action_ref, w_ref, out_ref, *,
                         state_in, action_in, s_rows, a_rows):
    """One batch tile of the fused discriminator MLP.

    w_ref row layout (all 128 lanes wide, zero padded, 8-aligned sections):
      [0            : s_rows)         W_s  (state_in x s_half in lanes [0:s_half))
      [s_rows       : s_rows+a_rows)  W_a  (action_in x a_half in lanes [s_half:d_rep))
      [r1           : r1+128)         W1 padded  (128, 128)
      [r2           : r2+128)         W2 padded  (128, 128)
      [r3           : r3+128)         W3 padded  (128, 128)
      last BIAS_ROWS rows             biases: row0=b_sa, row1=b1, row2=b2, row3=b3
    """
    f32 = jnp.float32
    r1 = s_rows + a_rows
    r2 = r1 + LANE
    r3 = r2 + LANE
    r4 = r3 + LANE

    biases = w_ref[r4:r4 + BIAS_ROWS, :]            # (8, 128)
    b_sa = biases[0:1, :]
    b1 = biases[1:2, :]
    b2 = biases[2:3, :]
    b3 = biases[3:4, :]

    s = state_ref[...].astype(f32)                  # (tile_b, state_in)
    a = action_ref[...].astype(f32)                 # (tile_b, action_in)

    # Representation linears + concat fused: the two dots write disjoint
    # lane ranges ([0:s_half) and [s_half:d_rep)), so their sum equals the
    # concatenated output; LeakyReLU on it equals LeakyReLU on the concat.
    h = (jnp.dot(s, w_ref[0:state_in, :], preferred_element_type=f32) +
         jnp.dot(a, w_ref[s_rows:s_rows + action_in, :],
                 preferred_element_type=f32) + b_sa)
    h = _leaky_relu(h)                              # padded lanes stay 0

    # TODO(synk): nn.Dropout(0.3) is identity here (inference mode).
    h = _leaky_relu(jnp.dot(h, w_ref[r1:r2, :], preferred_element_type=f32) + b1)
    h = _leaky_relu(jnp.dot(h, w_ref[r2:r3, :], preferred_element_type=f32) + b2)

    logits = jnp.dot(h, w_ref[r3:r4, :], preferred_element_type=f32) + b3
    validity = jnp.clip(jax.nn.sigmoid(logits), 1e-6, 1.0 - 1e-6)

    out_ref[...] = validity[:, :OUT_COLS].astype(out_ref.dtype)


@jax.jit
def discriminator_forward(state, action, w_slab):
    """state: (B, state_in), action: (B, action_in), w_slab: packed params."""
    B, state_in = state.shape
    _, action_in = action.shape
    s_rows = _round8(state_in)
    a_rows = _round8(action_in)
    n_w_rows = w_slab.shape[0]
    assert n_w_rows == s_rows + a_rows + 3 * LANE + BIAS_ROWS, "bad slab layout"

    # Batch tiling: small batches run in a single grid step; larger batches
    # use big tiles (amortize per-step overhead) while keeping >= 2 steps so
    # the "parallel" axis shards across v7x's two TensorCores.
    if B <= 128:
        tile_b = _round8(B)
    else:
        tile_b = min(_round8(pl.cdiv(B, 2)), MAX_TILE_B)
    b_pad = pl.cdiv(B, tile_b) * tile_b
    if b_pad != B:
        state = jnp.pad(state, ((0, b_pad - B), (0, 0)))
        action = jnp.pad(action, ((0, b_pad - B), (0, 0)))

    out = pl.pallas_call(
        functools.partial(discriminator_kernel, state_in=state_in,
                          action_in=action_in, s_rows=s_rows, a_rows=a_rows),
        out_shape=jax.ShapeDtypeStruct((b_pad, OUT_COLS), jnp.float32),
        grid_spec=pltpu.PrefetchScalarGridSpec(
            num_scalar_prefetch=0,
            grid=(b_pad // tile_b,),
            in_specs=[
                pl.BlockSpec((tile_b, state_in), lambda i: (i, 0)),
                pl.BlockSpec((tile_b, action_in), lambda i: (i, 0)),
                pl.BlockSpec((n_w_rows, LANE), lambda i: (0, 0)),  # resident
            ],
            out_specs=pl.BlockSpec((tile_b, OUT_COLS), lambda i: (i, 0)),
        ),
        compiler_params=pltpu.CompilerParams(
            dimension_semantics=("parallel",)),
    )(state, action, w_slab)

    return out[:B, :1]


def init_params(key, state_in, action_in):
    """Deterministic synthetic parameter init (PyTorch Linear shapes),
    weights stored transposed as [in_features, out_features]."""
    s_half = state_in // 2
    a_half = action_in // 2
    keys = jax.random.split(key, 10)

    def lin(kw, kb, fan_in, fan_out):
        bound = 1.0 / jnp.sqrt(fan_in)
        w = jax.random.uniform(kw, (fan_in, fan_out), jnp.float32, -bound, bound)
        b = jax.random.uniform(kb, (1, fan_out), jnp.float32, -bound, bound)
        return w, b

    ws, bs = lin(keys[0], keys[1], state_in, s_half)
    wa, ba = lin(keys[2], keys[3], action_in, a_half)
    w1, b1 = lin(keys[4], keys[5], s_half + a_half, 64)
    w2, b2 = lin(keys[6], keys[7], 64, 32)
    w3, b3 = lin(keys[8], keys[9], 32, 1)

    return {"ws": ws, "bs": bs, "wa": wa, "ba": ba,
            "w1": w1, "b1": b1, "w2": w2, "b2": b2, "w3": w3, "b3": b3}


def pack_params(params, state_in, action_in):
    """Pack all weights/biases into one lane-padded f32 slab (single DMA),
    each section rounded up to a multiple of 8 rows (sublane-aligned)."""
    s_half = state_in // 2
    a_half = action_in // 2
    d_rep = s_half + a_half
    s_rows = _round8(state_in)
    a_rows = _round8(action_in)

    w_s = jnp.zeros((s_rows, LANE), jnp.float32)
    w_s = w_s.at[:state_in, :s_half].set(params["ws"])
    w_a = jnp.zeros((a_rows, LANE), jnp.float32)
    w_a = w_a.at[:action_in, s_half:d_rep].set(params["wa"])

    def pad_w(w):
        out = jnp.zeros((LANE, LANE), jnp.float32)
        return out.at[:w.shape[0], :w.shape[1]].set(w)

    def pad_b(b):
        out = jnp.zeros((1, LANE), jnp.float32)
        return out.at[:, :b.shape[1]].set(b)

    b_sa = jnp.concatenate([params["bs"], params["ba"]], axis=1)  # (1, d_rep)
    bias_block = jnp.concatenate(
        [pad_b(b_sa), pad_b(params["b1"]), pad_b(params["b2"]),
         pad_b(params["b3"]), jnp.zeros((BIAS_ROWS - 4, LANE), jnp.float32)],
        axis=0)                                                   # (8, 128)

    slab = jnp.concatenate(
        [w_s, w_a, pad_w(params["w1"]), pad_w(params["w2"]),
         pad_w(params["w3"]), bias_block], axis=0)
    return slab


def reference_forward(state, action, params):
    """Pure-JAX reference with the original (unfused) structure."""
    s1 = _leaky_relu(state @ params["ws"] + params["bs"])
    a1 = _leaky_relu(action @ params["wa"] + params["ba"])
    h = jnp.concatenate([s1, a1], axis=1)
    h1 = _leaky_relu(h @ params["w1"] + params["b1"])
    h2 = _leaky_relu(h1 @ params["w2"] + params["b2"])
    y = jax.nn.sigmoid(h2 @ params["w3"] + params["b3"])
    return jnp.clip(y, 1e-6, 1.0 - 1e-6)


if __name__ == "__main__":
    # config.ctx_cell_size = 32, config.action_num = 16
    STATE_IN, ACTION_IN = 32, 16

    key = jax.random.PRNGKey(0)
    k_state, k_action, k_params = jax.random.split(key, 3)
    params = init_params(k_params, STATE_IN, ACTION_IN)
    w_slab = pack_params(params, STATE_IN, ACTION_IN)

    # Small batch: single grid step.
    B1 = 8
    state = jax.random.normal(k_state, (B1, STATE_IN), jnp.float32)
    action = jax.random.normal(k_action, (B1, ACTION_IN), jnp.float32)
    out = jax.block_until_ready(discriminator_forward(state, action, w_slab))
    ref = reference_forward(state, action, params)
    assert out.shape == (B1, 1)
    assert jnp.allclose(out, ref, atol=1e-5, rtol=1e-5), (out, ref)

    # Larger batch: exercises batch padding + 2-step "parallel" grid.
    B2 = 200
    state2 = jax.random.normal(jax.random.PRNGKey(1), (B2, STATE_IN), jnp.float32)
    action2 = jax.random.normal(jax.random.PRNGKey(2), (B2, ACTION_IN), jnp.float32)
    out2 = jax.block_until_ready(discriminator_forward(state2, action2, w_slab))
    ref2 = reference_forward(state2, action2, params)
    assert out2.shape == (B2, 1)
    assert jnp.allclose(out2, ref2, atol=1e-5, rtol=1e-5)

    print("KERNEL_OK")
</pallas_src>

<mosaic_0001>
module attributes {stable_mosaic.version = 11 : i64} {
  func.func @discriminator_kernel(%arg0: i32, %arg1: memref<8x32xf32, #tpu.memory_space<vmem>>, %arg2: memref<8x16xf32, #tpu.memory_space<vmem>>, %arg3: memref<440x128xf32, #tpu.memory_space<vmem>>, %arg4: memref<8x8xf32, #tpu.memory_space<vmem>>) attributes {dimension_semantics = [#tpu.dimension_semantics<parallel>], iteration_bounds = array<i64: 1>, scalar_prefetch = 0 : i64, scratch_operands = 0 : i64, tpu.core_type = #tpu.core_type<tc>, window_params = [{transform_indices = @transform_0, window_bounds = array<i64: 8, 32>}, {transform_indices = @transform_1, window_bounds = array<i64: 8, 16>}, {pipeline_mode = #tpu.pipeline_mode<synchronous>, transform_indices = @transform_2, window_bounds = array<i64: 440, 128>}, {transform_indices = @transform_3, window_bounds = array<i64: 8, 8>}]} {
    %c432 = arith.constant 432 : index
    %c0 = arith.constant 0 : index
    %0 = vector.load %arg3[%c432, %c0] : memref<440x128xf32, #tpu.memory_space<vmem>>, vector<8x128xf32>
    %1 = vector.extract_strided_slice %0 {offsets = [0, 0], sizes = [1, 128], strides = [1, 1]} : vector<8x128xf32> to vector<1x128xf32>
    %2 = vector.extract_strided_slice %0 {offsets = [1, 0], sizes = [1, 128], strides = [1, 1]} : vector<8x128xf32> to vector<1x128xf32>
    %3 = vector.extract_strided_slice %0 {offsets = [2, 0], sizes = [1, 128], strides = [1, 1]} : vector<8x128xf32> to vector<1x128xf32>
    %4 = vector.extract_strided_slice %0 {offsets = [3, 0], sizes = [1, 128], strides = [1, 1]} : vector<8x128xf32> to vector<1x128xf32>
    %c0_0 = arith.constant 0 : index
    %c0_1 = arith.constant 0 : index
    %5 = vector.load %arg1[%c0_0, %c0_1] : memref<8x32xf32, #tpu.memory_space<vmem>>, vector<8x32xf32>
    %c0_2 = arith.constant 0 : index
    %c0_3 = arith.constant 0 : index
    %6 = vector.load %arg2[%c0_2, %c0_3] : memref<8x16xf32, #tpu.memory_space<vmem>>, vector<8x16xf32>
    %c0_4 = arith.constant 0 : index
    %c0_5 = arith.constant 0 : index
    %7 = vector.load %arg3[%c0_4, %c0_5] : memref<440x128xf32, #tpu.memory_space<vmem>>, vector<32x128xf32>
    %cst = arith.constant dense<0.000000e+00> : vector<8x128xf32>
    %8 = tpu.matmul %5, %7, %cst {dimension_numbers = #tpu.dot_dimension_numbers<[1], [0], [0], [1], [0, 0, 1, 1], [], []>} : vector<8x32xf32>, vector<32x128xf32>, vector<8x128xf32> -> vector<8x128xf32>
    %c32 = arith.constant 32 : index
    %c0_6 = arith.constant 0 : index
    %9 = vector.load %arg3[%c32, %c0_6] : memref<440x128xf32, #tpu.memory_space<vmem>>, vector<16x128xf32>
    %cst_7 = arith.constant dense<0.000000e+00> : vector<8x128xf32>
    %10 = tpu.matmul %6, %9, %cst_7 {dimension_numbers = #tpu.dot_dimension_numbers<[1], [0], [0], [1], [0, 0, 1, 1], [], []>} : vector<8x16xf32>, vector<16x128xf32>, vector<8x128xf32> -> vector<8x128xf32>
    %11 = arith.addf %8, %10 : vector<8x128xf32>
    %12 = vector.broadcast %1 : vector<1x128xf32> to vector<8x128xf32>
    %13 = arith.addf %11, %12 : vector<8x128xf32>
    %cst_8 = arith.constant 2.000000e-01 : f32
    %14 = vector.broadcast %cst_8 : f32 to vector<8x128xf32>
    %15 = arith.mulf %14, %13 : vector<8x128xf32>
    %16 = arith.maximumf %13, %15 : vector<8x128xf32>
    %c48 = arith.constant 48 : index
    %c0_9 = arith.constant 0 : index
    %17 = vector.load %arg3[%c48, %c0_9] : memref<440x128xf32, #tpu.memory_space<vmem>>, vector<128x128xf32>
    %cst_10 = arith.constant dense<0.000000e+00> : vector<8x128xf32>
    %18 = tpu.matmul %16, %17, %cst_10 {dimension_numbers = #tpu.dot_dimension_numbers<[1], [0], [0], [1], [0, 0, 1, 1], [], []>} : vector<8x128xf32>, vector<128x128xf32>, vector<8x128xf32> -> vector<8x128xf32>
    %19 = vector.broadcast %2 : vector<1x128xf32> to vector<8x128xf32>
    %20 = arith.addf %18, %19 : vector<8x128xf32>
    %cst_11 = arith.constant 2.000000e-01 : f32
    %21 = vector.broadcast %cst_11 : f32 to vector<8x128xf32>
    %22 = arith.mulf %21, %20 : vector<8x128xf32>
    %23 = arith.maximumf %20, %22 : vector<8x128xf32>
    %c176 = arith.constant 176 : index
    %c0_12 = arith.constant 0 : index
    %24 = vector.load %arg3[%c176, %c0_12] : memref<440x128xf32, #tpu.memory_space<vmem>>, vector<128x128xf32>
    %cst_13 = arith.constant dense<0.000000e+00> : vector<8x128xf32>
    %25 = tpu.matmul %23, %24, %cst_13 {dimension_numbers = #tpu.dot_dimension_numbers<[1], [0], [0], [1], [0, 0, 1, 1], [], []>} : vector<8x128xf32>, vector<128x128xf32>, vector<8x128xf32> -> vector<8x128xf32>
    %26 = vector.broadcast %3 : vector<1x128xf32> to vector<8x128xf32>
    %27 = arith.addf %25, %26 : vector<8x128xf32>
    %cst_14 = arith.constant 2.000000e-01 : f32
    %28 = vector.broadcast %cst_14 : f32 to vector<8x128xf32>
    %29 = arith.mulf %28, %27 : vector<8x128xf32>
    %30 = arith.maximumf %27, %29 : vector<8x128xf32>
    %c304 = arith.constant 304 : index
    %c0_15 = arith.constant 0 : index
    %31 = vector.load %arg3[%c304, %c0_15] : memref<440x128xf32, #tpu.memory_space<vmem>>, vector<128x128xf32>
    %cst_16 = arith.constant dense<0.000000e+00> : vector<8x128xf32>
    %32 = tpu.matmul %30, %31, %cst_16 {dimension_numbers = #tpu.dot_dimension_numbers<[1], [0], [0], [1], [0, 0, 1, 1], [], []>} : vector<8x128xf32>, vector<128x128xf32>, vector<8x128xf32> -> vector<8x128xf32>
    %33 = vector.broadcast %4 : vector<1x128xf32> to vector<8x128xf32>
    %34 = arith.addf %32, %33 : vector<8x128xf32>
    %35 = arith.negf %34 : vector<8x128xf32>
    %36 = math.exp %35 : vector<8x128xf32>
    %cst_17 = arith.constant 1.000000e+00 : f32
    %37 = vector.broadcast %cst_17 : f32 to vector<8x128xf32>
    %38 = arith.addf %37, %36 : vector<8x128xf32>
    %39 = arith.divf %37, %38 : vector<8x128xf32>
    %cst_18 = arith.constant 9.99999997E-7 : f32
    %cst_19 = arith.constant 0.999998986 : f32
    %40 = vector.broadcast %cst_18 : f32 to vector<8x128xf32>
    %41 = arith.maximumf %40, %39 : vector<8x128xf32>
    %42 = vector.broadcast %cst_19 : f32 to vector<8x128xf32>
    %43 = arith.minimumf %42, %41 : vector<8x128xf32>
    %44 = vector.extract_strided_slice %43 {offsets = [0, 0], sizes = [8, 8], strides = [1, 1]} : vector<8x128xf32> to vector<8x8xf32>
    %c0_20 = arith.constant 0 : index
    %c0_21 = arith.constant 0 : index
    %45 = vector.load %arg4[%c0_20, %c0_21] : memref<8x8xf32, #tpu.memory_space<vmem>>, vector<8x8xf32>
    tpu.vector_store %arg4[%c0_20, %c0_21], %44 {strides = array<i32>} : memref<8x8xf32, #tpu.memory_space<vmem>>, vector<8x8xf32>,
    return
  }
  func.func @transform_0(%arg0: i32) -> (i32, i32) {
    %c0_i32 = arith.constant 0 : i32
    %c0_i32_0 = arith.constant 0 : i32
    return %arg0, %c0_i32 : i32, i32
  }
  func.func @transform_1(%arg0: i32) -> (i32, i32) {
    %c0_i32 = arith.constant 0 : i32
    %c0_i32_0 = arith.constant 0 : i32
    return %arg0, %c0_i32 : i32, i32
  }
  func.func @transform_2(%arg0: i32) -> (i32, i32) {
    %c0_i32 = arith.constant 0 : i32
    %c0_i32_0 = arith.constant 0 : i32
    %c0_i32_1 = arith.constant 0 : i32
    return %c0_i32, %c0_i32_0 : i32, i32
  }
  func.func @transform_3(%arg0: i32) -> (i32, i32) {
    %c0_i32 = arith.constant 0 : i32
    %c0_i32_0 = arith.constant 0 : i32
    return %arg0, %c0_i32 : i32, i32
  }
}

</mosaic_0001>

<bundles_post_ra>
// kernel: discriminator_forward.1
= control target key start
LH: loop header
LB: loop body
LE: loop exit
PB: predicated region body
PF: predicated region fallthrough
CT: control target
= control target key end

     0   :  { %8 = vsyncpa [#allocation3], 0  ;;  %s969_s0 = inlined_call_operand.hbm [shape: f32[8,32], index: 0, kind: input, shape index: {}]   ;;  %s970_s1 = inlined_call_operand.hbm [shape: f32[8,16], index: 1, kind: input, shape index: {}]   ;;  %s971_s2 = inlined_call_operand.hbm [shape: f32[440,128], index: 2, kind: input, shape index: {}]   ;;  %s972_s3 = inlined_call_operand.vmem [shape: f32[8,8], index: 3, kind: output, shape index: {}]  }
   0x1   :  { %9 = vsyncpa [#allocation5], 0  ;;  %s853_s12 = smov [#allocation4]   ;;  %s854_s14 = smov [#allocation2]  }
   0x2   :  { %s26_s13 = sshll.u32 %s853_s12, 4  ;;  %s16_s15 = sshll.u32 %s854_s14, 4  ;;  %s27_s13 = int_to_ptr.vmem [resolvable:$true] %s26_s13  ;;  %s17_s15 = int_to_ptr.vmem [resolvable:$true] %s16_s15 }
   0x3   :  { %s783_s18 = scalar_lea.hbm %s970_s1, 128 }
   0x4   :  { %p784_p0 = scmp.ne.s32.totalorder %s970_s1, %s783_s18  ;;  %p787_p1 = scmp.lt.u32.totalorder %s783_s18, %s970_s1 }
   0x6   :  { %p789_p2 = pnand %p787_p1, %p784_p0 }
   0x8   :  { %792 = shalt.err (!%p789_p2)
}
   0x9   :  { %s793_s23 = scalar_lea.vmem %s27_s13, 128  ;;  %p798_p4 = scmp.lt.s32.totalorder %s27_s13, %s27_s13 }
   0xa   :  { %p794_p3 = scmp.ne.s32.totalorder %s27_s13, %s793_s23  ;;  %p799_p5 = scmp.lt.s32.totalorder %s793_s23, %s793_s23 }
   0xc   :  { %p800_p6 = por %p799_p5, %p798_p4 }
   0xe   :  { %p801_p7 = pnand %p800_p6, %p794_p3 }
  0x10   :  { %804 = shalt.err (!%p801_p7)
}
  0x11   :  { %29 = dma.hbm_to_vmem [thread:$0]  %s970_s1, 128, %s27_s13, [#allocation5]  }
  0x12   :  { %s805_s28 = scalar_lea.hbm %s969_s0, 128 }
  0x13   :  { %p806_p8 = scmp.ne.s32.totalorder %s969_s0, %s805_s28  ;;  %p809_p9 = scmp.lt.u32.totalorder %s805_s28, %s969_s0 }
  0x15   :  { %p811_p10 = pnand %p809_p9, %p806_p8 }
  0x17   :  { %814 = shalt.err (!%p811_p10)
}
  0x18   :  { %s815_s6 = scalar_lea.vmem %s17_s15, 128  ;;  %p820_p12 = scmp.lt.s32.totalorder %s17_s15, %s17_s15 }
  0x19   :  { %p816_p11 = scmp.ne.s32.totalorder %s17_s15, %s815_s6  ;;  %p821_p13 = scmp.lt.s32.totalorder %s815_s6, %s815_s6 }
  0x1b   :  { %p822_p0 = por %p821_p13, %p820_p12 }
  0x1d   :  { %p823_p1 = pnand %p822_p0, %p816_p11 }
  0x1f   :  { %826 = shalt.err (!%p823_p1)
}
  0x20   :  { %19 = dma.hbm_to_vmem [thread:$0]  %s969_s0, 128, %s17_s15, [#allocation3]  }
  0x21   :  { %s855_s8 = smov [#allocation6]   ;;  %s827_s12 = scalar_lea.hbm %s971_s2, 7040 }
  0x22   :  { %s35_s9 = sshll.u32 %s855_s8, 4  ;;  %p828_p2 = scmp.ne.s32.totalorder %s971_s2, %s827_s12  ;;  %s36_s9 = int_to_ptr.vmem [resolvable:$true] %s35_s9 }
  0x23   :  { %p831_p3 = scmp.lt.u32.totalorder %s827_s12, %s971_s2 }
  0x25   :  { %p833_p4 = pnand %p831_p3, %p828_p2 }
  0x27   :  { %836 = shalt.err (!%p833_p4)
}
  0x28   :  { %s837_s18 = scalar_lea.vmem %s36_s9, 7040  ;;  %p842_p6 = scmp.lt.s32.totalorder %s36_s9, %s36_s9 }
  0x29   :  { %p838_p5 = scmp.ne.s32.totalorder %s36_s9, %s837_s18  ;;  %p843_p7 = scmp.lt.s32.totalorder %s837_s18, %s837_s18 }
  0x2b   :  { %p844_p8 = por %p843_p7, %p842_p6 }
  0x2d   :  { %p845_p9 = pnand %p844_p8, %p838_p5 }
  0x2f   :  { %848 = shalt.err (!%p845_p9)
}
  0x30   :  { %s856_s0 = smov 128   ;;  %s857_s15 = smov 8  }
  0x31   :  { %41 = dma.hbm_to_vmem [thread:$0]  %s971_s2, 7040, %s36_s9, [#allocation5], %s856_s0, %s856_s0, %s857_s15  }
  0x32   :  { %849 = dma.done.wait [#allocation3], 128  }
  0x33   :  { %850 = vsyncadd [#allocation3], 4294967168 }
  0x34   :  { %851 = dma.done.wait [#allocation5], 7168  }
  0x35   :  { %852 = vsyncadd [#allocation5], 4294960128  ;;  %v858_v0 = vmov 0.0|0.0   ;;  %vm859_vm0 = vmmov 0   ;;  %v860_v1 = vmov 0.0   ;;  %v58_v2 = vld [vmem:[#allocation6 + $0x20] sm:$0xff]  ;;  %v208_v55 = vlaneseq }
  0x36   :  { %690 = vmatprep.subr.bf16.mxu1 %v858_v0  ;;  %571 = vmatprep.mubr.msk.f32.mxu1 %vm859_vm0, %v860_v1  ;;  %v59_v3 = vld [vmem:[#allocation6 + $0x28] sm:$0xff]  ;;  %v54_v5 = vld [vmem:[#allocation6] sm:$0xff]  ;;  %v53_v7 = vld [vmem:[#allocation4] sm:$0xff]  ;;  %vm60_vm1 = vcmask 130048   ;;  %vm134_vm2 = vcmask 261120   ;;  %vm497_vm3 = vcmask 64512  }
  0x37   :  { %699 = vmatprep.subr.bf16.mxu0 %v858_v0  ;;  %617 = vmatprep.mubr.msk.f32.mxu0 %vm859_vm0, %v860_v1  ;;  %v691_v4 = vpack.c.bf16 %v59_v3, %v58_v2  ;;  %v55_v6 = vld [vmem:[#allocation6 + $0x8] sm:$0xff]  ;;  %v215_v8 = vld [vmem:[#allocation6 + $0x30] sm:$0xff]  ;;  %v216_v10 = vld [vmem:[#allocation6 + $0x38] sm:$0xff]  ;;  %v944_v56 = vshrl.u32 %v208_v55, 7 }
  0x38   :  { %v694_v9 = vpack.c.bf16 %v55_v6, %v54_v5  ;;  %v217_v11 = vld [vmem:[#allocation6 + $0x40] sm:$0xff]  ;;  %v218_v12 = vld [vmem:[#allocation6 + $0x48] sm:$0xff]  ;;  %v56_v13 = vld [vmem:[#allocation6 + $0x10] sm:$0xff]  ;;  %v700_v15 = vpack.c.bf16 %v216_v10, %v215_v8 }
  0x39   :  { %692 = vmatpush3.bf16.msra.mxu1 %v691_v4  ;;  %v57_v14 = vld [vmem:[#allocation6 + $0x18] sm:$0xff]  ;;  %v703_v16 = vpack.c.bf16 %v218_v12, %v217_v11  ;;  %v219_v18 = vld [vmem:[#allocation6 + $0x50] sm:$0xff]  ;;  %v221_v22 = vld [vmem:[#allocation6 + $0x60] sm:$0xff]  ;;  %v210_v59 = vsub.s32 0, %v944_v56 }
  0x3a   :  { %693 = vmatprep.subr.bf16.mxu1 %v858_v0  ;;  %701 = vmatpush3.bf16.msra.mxu0 %v700_v15  ;;  %v697_v17 = vpack.c.bf16 %v57_v14, %v56_v13  ;;  %v220_v19 = vld [vmem:[#allocation6 + $0x58] sm:$0xff]  ;;  %v52_v21 = vld [vmem:[#allocation2] sm:$0xff]  ;;  %v222_v23 = vld [vmem:[#allocation6 + $0x68] sm:$0xff] }
  0x3b   :  { %702 = vmatprep.subr.bf16.mxu0 %v858_v0  ;;  %v706_v20 = vpack.c.bf16 %v220_v19, %v219_v18  ;;  %v709_v24 = vpack.c.bf16 %v222_v23, %v221_v22  ;;  %v223_v25 = vld [vmem:[#allocation6 + $0x70] sm:$0xff]  ;;  %v224_v26 = vld [vmem:[#allocation6 + $0x78] sm:$0xff]  ;;  %v225_v28 = vld [vmem:[#allocation6 + $0x80] sm:$0xff] }
  0x3c   :  { %572 = vmatmul.mubr.msk.f32.vlgmr.msra.gmra.mrb[0].mxu1 %vm60_vm1, %v53_v7  ;;  %v712_v27 = vpack.c.bf16 %v224_v26, %v223_v25  ;;  %v226_v29 = vld [vmem:[#allocation6 + $0x88] sm:$0xff]  ;;  %v227_v31 = vld [vmem:[#allocation6 + $0x90] sm:$0xff]  ;;  %v228_v32 = vld [vmem:[#allocation6 + $0x98] sm:$0xff] }
  0x3d   :  { %695 = vmatpush3.bf16.msra.mxu1 %v694_v9  ;;  %582 = vmatprep.mubr.msk.f32.mxu1 %vm859_vm0, %v860_v1  ;;  %v715_v30 = vpack.c.bf16 %v226_v29, %v225_v28  ;;  %v718_v33 = vpack.c.bf16 %v228_v32, %v227_v31  ;;  %v229_v34 = vld [vmem:[#allocation6 + $0xa0] sm:$0xff]  ;;  %v230_v35 = vld [vmem:[#allocation6 + $0xa8] sm:$0xff]  ;;  %v307_v37 = vld [vmem:[#allocation6 + $0xb0] sm:$0xff]  ;;  %v233_v29 = vsub.s32 1, %v944_v56 }
  0x3e   :  { %696 = vmatprep.subr.bf16.mxu1 %v858_v0  ;;  %704 = vmatpush3.bf16.msra.mxu0 %v703_v16  ;;  %v721_v36 = vpack.c.bf16 %v230_v35, %v229_v34  ;;  %v308_v38 = vld [vmem:[#allocation6 + $0xb8] sm:$0xff]  ;;  %v309_v39 = vld [vmem:[#allocation6 + $0xc0] sm:$0xff]  ;;  %v310_v41 = vld [vmem:[#allocation6 + $0xc8] sm:$0xff] }
  0x3f   :  { %705 = vmatprep.subr.bf16.mxu0 %v858_v0  ;;  %v724_v40 = vpack.c.bf16 %v308_v38, %v307_v37  ;;  %v727_v42 = vpack.c.bf16 %v310_v41, %v309_v39  ;;  %v311_v43 = vld [vmem:[#allocation6 + $0xd0] sm:$0xff]  ;;  %v312_v44 = vld [vmem:[#allocation6 + $0xd8] sm:$0xff]  ;;  %v313_v46 = vld [vmem:[#allocation6 + $0xe0] sm:$0xff] }
  0x40   :  { %v730_v45 = vpack.c.bf16 %v312_v44, %v311_v43  ;;  %v314_v47 = vld [vmem:[#allocation6 + $0xe8] sm:$0xff]  ;;  %v315_v49 = vld [vmem:[#allocation6 + $0xf0] sm:$0xff]  ;;  %v316_v50 = vld [vmem:[#allocation6 + $0xf8] sm:$0xff] }
  0x41   :  { %698 = vmatpush3.bf16.msra.mxu1 %v697_v17  ;;  %v733_v48 = vpack.c.bf16 %v314_v47, %v313_v46  ;;  %v736_v51 = vpack.c.bf16 %v316_v50, %v315_v49  ;;  %v317_v52 = vld [vmem:[#allocation6 + $0x100] sm:$0xff]  ;;  %v318_v53 = vld [vmem:[#allocation6 + $0x108] sm:$0xff]  ;;  %v947_v60 = vld [vmem:[#allocation6 + $0x1b0] sm:$0xff]  ;;  %v417_v49 = vsub.s32 3, %v944_v56 }
  0x42   :  { %723 = vmatprep.subr.bf16.mxu1 %v858_v0  ;;  %707 = vmatpush3.bf16.msra.mxu0 %v706_v20  ;;  %v739_v54 = vpack.c.bf16 %v318_v53, %v317_v52  ;;  %v211_v61 = vrot.slane %v947_v60, %v210_v59  ;;  %v319_v6 = vld [vmem:[#allocation6 + $0x110] sm:$0xff]  ;;  %v320_v7 = vld [vmem:[#allocation6 + $0x118] sm:$0xff]  ;;  %v321_v9 = vld [vmem:[#allocation6 + $0x120] sm:$0xff] }
  0x43   :  { %708 = vmatprep.subr.bf16.mxu0 %v858_v0  ;;  %v742_v8 = vpack.c.bf16 %v320_v7, %v319_v6  ;;  %v322_v10 = vld [vmem:[#allocation6 + $0x128] sm:$0xff]  ;;  %v399_v12 = vld [vmem:[#allocation6 + $0x130] sm:$0xff]  ;;  %v400_v13 = vld [vmem:[#allocation6 + $0x138] sm:$0xff]  ;;  %v418_v50 = vrot.slane %v947_v60, %v417_v49 }
  0x44   :  { %583 = vmatmul.mubr.msk.f32.vlgmr.msra.gmra.mrb[2].mxu1 %vm134_vm2, %v52_v21  ;;  %v745_v11 = vpack.c.bf16 %v322_v10, %v321_v9  ;;  %v401_v14 = vld [vmem:[#allocation6 + $0x140] sm:$0xff]  ;;  %v748_v15 = vpack.c.bf16 %v400_v13, %v399_v12  ;;  %v402_v16 = vld [vmem:[#allocation6 + $0x148] sm:$0xff]  ;;  %v404_v18 = vld [vmem:[#allocation6 + $0x158] sm:$0xff] }
  0x45   :  { %652 = vmatprep.mubr.msk.f32.mxu1 %vm859_vm0, %v860_v1  ;;  %725 = vmatpush3.bf16.msra.mxu1 %v724_v40  ;;  %v751_v17 = vpack.c.bf16 %v402_v16, %v401_v14  ;;  %v405_v20 = vld [vmem:[#allocation6 + $0x160] sm:$0xff]  ;;  %v406_v21 = vld [vmem:[#allocation6 + $0x168] sm:$0xff]  ;;  %v407_v23 = vld [vmem:[#allocation6 + $0x170] sm:$0xff] }
  0x46   :  { %710 = vmatpush3.bf16.msra.mxu0 %v709_v24  ;;  %726 = vmatprep.subr.bf16.mxu1 %v858_v0  ;;  %v757_v22 = vpack.c.bf16 %v406_v21, %v405_v20  ;;  %v408_v24 = vld [vmem:[#allocation6 + $0x178] sm:$0xff]  ;;  %v409_v26 = vld [vmem:[#allocation6 + $0x180] sm:$0xff]  ;;  %v414_v40 = vld [vmem:[#allocation6 + $0x1a8] sm:$0xff] }
  0x47   :  { %711 = vmatprep.subr.bf16.mxu0 %v858_v0  ;;  %v760_v25 = vpack.c.bf16 %v408_v24, %v407_v23  ;;  %v412_v37 = vld [vmem:[#allocation6 + $0x198] sm:$0xff]  ;;  %v413_v39 = vld [vmem:[#allocation6 + $0x1a0] sm:$0xff] }
  0x48   :  { %v769_v41 = vpack.c.bf16 %v414_v40, %v413_v39 }
  0x49   :  { %728 = vmatpush3.bf16.msra.mxu1 %v727_v42  ;;  %v325_v42 = vsub.s32 2, %v944_v56 }
  0x4a   :  { %713 = vmatpush3.bf16.msra.mxu0 %v712_v27  ;;  %729 = vmatprep.subr.bf16.mxu1 %v858_v0  ;;  %v410_v27 = vld [vmem:[#allocation6 + $0x188] sm:$0xff] }
  0x4b   :  { %714 = vmatprep.subr.bf16.mxu0 %v858_v0  ;;  %v763_v28 = vpack.c.bf16 %v410_v27, %v409_v26  ;;  %v326_v43 = vrot.slane %v947_v60, %v325_v42 }
  0x4d   :  { %731 = vmatpush3.bf16.msra.mxu1 %v730_v45 }
  0x4e   :  { %716 = vmatpush3.bf16.msra.mxu0 %v715_v30  ;;  %732 = vmatprep.subr.bf16.mxu1 %v858_v0  ;;  %v234_v30 = vrot.slane %v947_v60, %v233_v29 }
  0x4f   :  { %717 = vmatprep.subr.bf16.mxu0 %v858_v0 }
  0x51   :  { %734 = vmatpush3.bf16.msra.mxu1 %v733_v48 }
  0x52   :  { %719 = vmatpush3.bf16.msra.mxu0 %v718_v33  ;;  %735 = vmatprep.subr.bf16.mxu1 %v858_v0 }
  0x53   :  { %720 = vmatprep.subr.bf16.mxu0 %v858_v0 }
  0x55   :  { %737 = vmatpush3.bf16.msra.mxu1 %v736_v51 }
  0x56   :  { %722 = vmatpush3.bf16.msra.mxu0 %v721_v36  ;;  %738 = vmatprep.subr.bf16.mxu1 %v858_v0  ;;  %v411_v36 = vld [vmem:[#allocation6 + $0x190] sm:$0xff] }
  0x57   :  { %747 = vmatprep.subr.bf16.mxu0 %v858_v0  ;;  %v766_v38 = vpack.c.bf16 %v412_v37, %v411_v36 }
  0x59   :  { %740 = vmatpush3.bf16.msra.mxu1 %v739_v54 }
  0x5a   :  { %741 = vmatprep.subr.bf16.mxu1 %v858_v0 }
  0x5d   :  { %743 = vmatpush3.bf16.msra.mxu1 %v742_v8 }
  0x5e   :  { %744 = vmatprep.subr.bf16.mxu1 %v858_v0 }
  0x61   :  { %746 = vmatpush3.bf16.msra.mxu1 %v745_v11 }
 0x10f   :  { %v130_v57 = vpop.f32.mrb[0].mxu1 }
 0x110   :  { %v573_v58 = vpop.f32.mrb[1].mxu1 }
 0x117   :  { %v204_v62 = vpop.f32.mrb[2].mxu1 }
 0x118   :  { %v205_v63 = vadd.f32 %v204_v62, %v130_v57  ;;  %v584_v2 = vpop.f32.mrb[3].mxu1 }
 0x11a   :  { %v212_v3 = vadd.f32 %v211_v61, %v205_v63 }
 0x11c   :  { %v213_v4 = vmul.f32 0.2, %v212_v3 }
 0x11e   :  { %v214_v5 = vmax.f32 %v212_v3, %v213_v4 }
 0x120   :  { %618 = vmatmul.mubr.f32.vlgmr.msra.gmra.mrb[0].mxu0 %v214_v5 }
 0x121   :  { %687 = vmatprep.mubr.msk.f32.mxu0 %vm859_vm0, %v860_v1  ;;  %749 = vmatpush3.bf16.msra.mxu0 %v748_v15  ;;  %v403_v1 = vld [vmem:[#allocation6 + $0x150] sm:$0xff] }
 0x122   :  { %750 = vmatprep.subr.bf16.mxu0 %v858_v0  ;;  %v754_v19 = vpack.c.bf16 %v404_v18, %v403_v1 }
 0x125   :  { %752 = vmatpush3.bf16.msra.mxu0 %v751_v17 }
 0x126   :  { %753 = vmatprep.subr.bf16.mxu0 %v858_v0 }
 0x129   :  { %755 = vmatpush3.bf16.msra.mxu0 %v754_v19 }
 0x12a   :  { %756 = vmatprep.subr.bf16.mxu0 %v858_v0 }
 0x12d   :  { %758 = vmatpush3.bf16.msra.mxu0 %v757_v22 }
 0x12e   :  { %759 = vmatprep.subr.bf16.mxu0 %v858_v0 }
 0x131   :  { %761 = vmatpush3.bf16.msra.mxu0 %v760_v25 }
 0x132   :  { %762 = vmatprep.subr.bf16.mxu0 %v858_v0 }
 0x135   :  { %764 = vmatpush3.bf16.msra.mxu0 %v763_v28 }
 0x136   :  { %765 = vmatprep.subr.bf16.mxu0 %v858_v0 }
 0x139   :  { %767 = vmatpush3.bf16.msra.mxu0 %v766_v38 }
 0x13a   :  { %768 = vmatprep.subr.bf16.mxu0 %v858_v0 }
 0x13d   :  { %770 = vmatpush3.bf16.msra.mxu0 %v769_v41 }
 0x1f3   :  { %v301_v31 = vpop.f32.mrb[0].mxu0 }
 0x1f4   :  { %v302_v32 = vadd.f32 %v301_v31, %v234_v30  ;;  %v619_v33 = vpop.f32.mrb[1].mxu0 }
 0x1f6   :  { %v305_v34 = vmul.f32 0.2, %v302_v32 }
 0x1f8   :  { %v306_v35 = vmax.f32 %v302_v32, %v305_v34 }
 0x1fa   :  { %653 = vmatmul.mubr.f32.vlgmr.msra.gmra.mrb[4].mxu1 %v306_v35 }
 0x2cd   :  { %v393_v44 = vpop.f32.mrb[4].mxu1 }
 0x2ce   :  { %v394_v45 = vadd.f32 %v393_v44, %v326_v43  ;;  %v654_v46 = vpop.f32.mrb[5].mxu1 }
 0x2d0   :  { %v397_v47 = vmul.f32 0.2, %v394_v45 }
 0x2d2   :  { %v398_v48 = vmax.f32 %v394_v45, %v397_v47 }
 0x2d4   :  { %688 = vmatmul.mubr.f32.vlgmr.msra.gmra.mrb[2].mxu0 %v398_v48 }
 0x3a7   :  { %v485_v51 = vpop.f32.mrb[2].mxu0 }
 0x3a8   :  { %v486_v0 = vadd.f32 %v485_v51, %v418_v50  ;;  %v689_v52 = vpop.f32.mrb[3].mxu0 }
 0x3aa   :  { %v507_v53 = vmul.f32 -1.442695, %v486_v0 }
 0x3ac   :  { %779 = vpow2.f32 %v507_v53 }
 0x3b6   :  { %v780_v54 = vpop.eup %779 }
 0x3b7   :  { %v492_v55 = vadd.f32 1.0, %v780_v54 }
 0x3b9   :  { %781 = vrcp.f32 %v492_v55 }
 0x3c3   :  { %v782_v57 = vpop.eup %781 }
 0x3c4   :  { %v495_v58 = vmax.f32 %v782_v57, 1e-06 }
 0x3c6   :  { %v496_v59 = vmin.f32 %v495_v58, 0.999999 }
 0x3c8   :  { %498 = vst.msk [vmem:[%s972_s3] sm:$0xff] %vm497_vm3, %v496_v59 }
 0x3c9   :  { %503 = vsyncpa [#allocation3], 1 }
 0x3ca   :  { %504 = vsyncpa [#allocation5], 1 }

</bundles_post_ra>
